<compile_context>
chip_gen: v5e
topology: v5e:2x2
jax: 0.10.0
libtpu: 0.0.40
codegen_flags: <defaults>
</compile_context>

<pallas_src>
import jax
import jax.numpy as jnp
from jax import lax
from jax.experimental import pallas as pl
from jax.experimental.pallas import tpu as pltpu


def rnn_classify_kernel(tok_ref, eproj_ref, whh_ref, wcls_ref, bcls_ref, out_ref):
    """Fused token gather + tanh-RNN recurrence + classifier head.

    tok_ref  : (S*B, 1) int32 — tokens, time-major flattened (row = t*B + b)
    eproj_ref: (V, H)   f32   — embedding @ W_ih + (b_ih + b_hh)
    whh_ref  : (H, H)   f32   — hidden->hidden weight (pre-transposed)
    wcls_ref : (H, C)   f32   — classifier weight (pre-transposed)
    bcls_ref : (1, C)   f32   — classifier bias
    out_ref  : (B, C)   f32   — logits
    """
    SB = tok_ref.shape[0]
    V, H = eproj_ref.shape
    B, C = out_ref.shape
    S = SB // B

    # Fused gather: one-hot(tokens) @ eproj yields every step's projected input
    # (biases already folded in) with one tiny MXU matmul, entirely off the
    # serial chain. (16,27)@(27,32) — a single vmatmul worth of work.
    iota = lax.broadcasted_iota(jnp.int32, (SB, V), 1)
    onehot = (tok_ref[...] == iota).astype(jnp.float32)          # (S*B, V)
    x_all = jnp.dot(onehot, eproj_ref[...],
                    preferred_element_type=jnp.float32)          # (S*B, H)

    whh = whh_ref[...]                  # hoisted: one vreg, loaded once
    h = jnp.zeros((B, H), jnp.float32)  # h0 = 0, carried in vregs

    # Statically unrolled recurrence over the compile-time-constant S: static
    # sublane slices of x_all (no dynamic-slice relayouts), serial dependency
    # only through h (the minimum an RNN allows).
    for t in range(S):
        x_t = x_all[t * B:(t + 1) * B, :]                        # (B, H) static slice
        h = jnp.tanh(x_t + jnp.dot(h, whh, preferred_element_type=jnp.float32))

    # Classifier head on the final hidden state (== ht.squeeze() in PyTorch).
    out_ref[...] = (jnp.dot(h, wcls_ref[...], preferred_element_type=jnp.float32)
                    + bcls_ref[...])


def torch_model_forward(x_tokens, params):
    """x_tokens: int32 (B, S). Returns logits (B, sequence_len) like TorchModel.forward(x)."""
    emb = params["embedding"]          # (V, D)
    w_ih = params["w_ih"]              # (D, H)  == nn.RNN weight_ih_l0.T
    w_hh = params["w_hh"]              # (H, H)  == nn.RNN weight_hh_l0.T
    b = params["b"]                    # (1, H)  == b_ih + b_hh
    w_cls = params["w_cls"]            # (H, C)  == classify.weight.T
    b_cls = params["b_cls"]            # (1, C)

    B, S = x_tokens.shape
    C = w_cls.shape[1]

    # Fold the input projection + both RNN biases into the embedding table once
    # ((V,D)@(D,H) = (27,16)@(16,32), trivially small, amortized over the batch).
    eproj = emb @ w_ih + b                                       # (V, H)

    # Time-major flattened tokens so the kernel's gather output is already in
    # recurrence order (a 64-byte int reshape, not an activation transpose).
    tok_tm = jnp.transpose(x_tokens).reshape(S * B, 1).astype(jnp.int32)

    vmem = pl.BlockSpec(memory_space=pltpu.MemorySpace.VMEM)
    # Gridless single invocation: every operand lives whole in VMEM.
    out = pl.pallas_call(
        rnn_classify_kernel,
        out_shape=jax.ShapeDtypeStruct((B, C), jnp.float32),
        in_specs=[vmem] * 5,
        out_specs=vmem,
    )(tok_tm, eproj, w_hh, w_cls, b_cls)
    return out


def init_params(key, vocab_size, vector_dim, hidden_size, sequence_len):
    ks = jax.random.split(key, 7)
    scale = 0.1
    return {
        "embedding": scale * jax.random.normal(ks[0], (vocab_size, vector_dim), jnp.float32),
        "w_ih": scale * jax.random.normal(ks[1], (vector_dim, hidden_size), jnp.float32),
        "w_hh": scale * jax.random.normal(ks[2], (hidden_size, hidden_size), jnp.float32),
        # b_ih + b_hh folded into a single bias (exactly how nn.RNN applies them)
        "b": (scale * jax.random.normal(ks[3], (1, hidden_size), jnp.float32)
              + scale * jax.random.normal(ks[4], (1, hidden_size), jnp.float32)),
        "w_cls": scale * jax.random.normal(ks[5], (hidden_size, sequence_len), jnp.float32),
        "b_cls": scale * jax.random.normal(ks[6], (1, sequence_len), jnp.float32),
    }


def reference_forward(x_tokens, params):
    """Pure-JAX reference matching nn.Embedding + nn.RNN(batch_first) + nn.Linear."""
    xe = jnp.take(params["embedding"], x_tokens, axis=0)  # (B, S, D)
    B, S, _ = xe.shape
    H = params["w_hh"].shape[0]
    h = jnp.zeros((B, H), jnp.float32)
    for t in range(S):
        h = jnp.tanh(xe[:, t, :] @ params["w_ih"] + h @ params["w_hh"] + params["b"])
    return h @ params["w_cls"] + params["b_cls"]


if __name__ == "__main__":
    # Small shapes consistent with the module's constructor.
    vector_dim = 16
    sequence_len = 8      # also the number of output classes
    vocab_size = 27
    hidden_size = 32
    batch = 2

    key = jax.random.PRNGKey(0)
    pkey, xkey = jax.random.split(key)
    params = init_params(pkey, vocab_size, vector_dim, hidden_size, sequence_len)

    x_tokens = jax.random.randint(xkey, (batch, sequence_len), 0, vocab_size, jnp.int32)

    forward = jax.jit(torch_model_forward)
    y_pred = jax.block_until_ready(forward(x_tokens, params))

    y_ref = reference_forward(x_tokens, params)
    assert y_pred.shape == (batch, sequence_len)
    assert jnp.allclose(y_pred, y_ref, atol=1e-5, rtol=1e-5)

    # TODO(synk): the y != None cross-entropy training branch is not kernelized;
    # only the inference forward (y_pred) path is implemented in Pallas.
    print("KERNEL_OK")
</pallas_src>

<mosaic_0001>
module attributes {stable_mosaic.version = 11 : i64} {
  func.func @rnn_classify_kernel(%arg0: memref<16x1xi32, #tpu.memory_space<vmem>>, %arg1: memref<27x32xf32, #tpu.memory_space<vmem>>, %arg2: memref<32x32xf32, #tpu.memory_space<vmem>>, %arg3: memref<32x8xf32, #tpu.memory_space<vmem>>, %arg4: memref<1x8xf32, #tpu.memory_space<vmem>>, %arg5: memref<2x8xf32, #tpu.memory_space<vmem>>) attributes {dimension_semantics = [], scalar_prefetch = 0 : i64, scratch_operands = 0 : i64, tpu.core_type = #tpu.core_type<tc>} {
    %0 = tpu.iota {dimensions = array<i32: 1>} : vector<16x27xi32>
    %c0 = arith.constant 0 : index
    %c0_0 = arith.constant 0 : index
    %1 = vector.load %arg0[%c0, %c0_0] : memref<16x1xi32, #tpu.memory_space<vmem>>, vector<16x1xi32>
    %2 = vector.broadcast %1 : vector<16x1xi32> to vector<16x27xi32>
    %3 = arith.cmpi eq, %2, %0 : vector<16x27xi32>
    %4 = arith.extui %3 : vector<16x27xi1> to vector<16x27xi32>
    %5 = arith.sitofp %4 : vector<16x27xi32> to vector<16x27xf32>
    %c0_1 = arith.constant 0 : index
    %c0_2 = arith.constant 0 : index
    %6 = vector.load %arg1[%c0_1, %c0_2] : memref<27x32xf32, #tpu.memory_space<vmem>>, vector<27x32xf32>
    %cst = arith.constant dense<0.000000e+00> : vector<16x32xf32>
    %7 = tpu.matmul %5, %6, %cst {dimension_numbers = #tpu.dot_dimension_numbers<[1], [0], [0], [1], [0, 0, 1, 1], [], []>} : vector<16x27xf32>, vector<27x32xf32>, vector<16x32xf32> -> vector<16x32xf32>
    %c0_3 = arith.constant 0 : index
    %c0_4 = arith.constant 0 : index
    %8 = vector.load %arg2[%c0_3, %c0_4] : memref<32x32xf32, #tpu.memory_space<vmem>>, vector<32x32xf32>
    %cst_5 = arith.constant 0.000000e+00 : f32
    %9 = vector.broadcast %cst_5 : f32 to vector<2x32xf32>
    %10 = vector.extract_strided_slice %7 {offsets = [0, 0], sizes = [2, 32], strides = [1, 1]} : vector<16x32xf32> to vector<2x32xf32>
    %cst_6 = arith.constant dense<0.000000e+00> : vector<2x32xf32>
    %11 = tpu.matmul %9, %8, %cst_6 {dimension_numbers = #tpu.dot_dimension_numbers<[1], [0], [0], [1], [0, 0, 1, 1], [], []>} : vector<2x32xf32>, vector<32x32xf32>, vector<2x32xf32> -> vector<2x32xf32>
    %12 = arith.addf %10, %11 : vector<2x32xf32>
    %13 = math.tanh %12 : vector<2x32xf32>
    %14 = vector.extract_strided_slice %7 {offsets = [2, 0], sizes = [2, 32], strides = [1, 1]} : vector<16x32xf32> to vector<2x32xf32>
    %cst_7 = arith.constant dense<0.000000e+00> : vector<2x32xf32>
    %15 = tpu.matmul %13, %8, %cst_7 {dimension_numbers = #tpu.dot_dimension_numbers<[1], [0], [0], [1], [0, 0, 1, 1], [], []>} : vector<2x32xf32>, vector<32x32xf32>, vector<2x32xf32> -> vector<2x32xf32>
    %16 = arith.addf %14, %15 : vector<2x32xf32>
    %17 = math.tanh %16 : vector<2x32xf32>
    %18 = vector.extract_strided_slice %7 {offsets = [4, 0], sizes = [2, 32], strides = [1, 1]} : vector<16x32xf32> to vector<2x32xf32>
    %cst_8 = arith.constant dense<0.000000e+00> : vector<2x32xf32>
    %19 = tpu.matmul %17, %8, %cst_8 {dimension_numbers = #tpu.dot_dimension_numbers<[1], [0], [0], [1], [0, 0, 1, 1], [], []>} : vector<2x32xf32>, vector<32x32xf32>, vector<2x32xf32> -> vector<2x32xf32>
    %20 = arith.addf %18, %19 : vector<2x32xf32>
    %21 = math.tanh %20 : vector<2x32xf32>
    %22 = vector.extract_strided_slice %7 {offsets = [6, 0], sizes = [2, 32], strides = [1, 1]} : vector<16x32xf32> to vector<2x32xf32>
    %cst_9 = arith.constant dense<0.000000e+00> : vector<2x32xf32>
    %23 = tpu.matmul %21, %8, %cst_9 {dimension_numbers = #tpu.dot_dimension_numbers<[1], [0], [0], [1], [0, 0, 1, 1], [], []>} : vector<2x32xf32>, vector<32x32xf32>, vector<2x32xf32> -> vector<2x32xf32>
    %24 = arith.addf %22, %23 : vector<2x32xf32>
    %25 = math.tanh %24 : vector<2x32xf32>
    %26 = vector.extract_strided_slice %7 {offsets = [8, 0], sizes = [2, 32], strides = [1, 1]} : vector<16x32xf32> to vector<2x32xf32>
    %cst_10 = arith.constant dense<0.000000e+00> : vector<2x32xf32>
    %27 = tpu.matmul %25, %8, %cst_10 {dimension_numbers = #tpu.dot_dimension_numbers<[1], [0], [0], [1], [0, 0, 1, 1], [], []>} : vector<2x32xf32>, vector<32x32xf32>, vector<2x32xf32> -> vector<2x32xf32>
    %28 = arith.addf %26, %27 : vector<2x32xf32>
    %29 = math.tanh %28 : vector<2x32xf32>
    %30 = vector.extract_strided_slice %7 {offsets = [10, 0], sizes = [2, 32], strides = [1, 1]} : vector<16x32xf32> to vector<2x32xf32>
    %cst_11 = arith.constant dense<0.000000e+00> : vector<2x32xf32>
    %31 = tpu.matmul %29, %8, %cst_11 {dimension_numbers = #tpu.dot_dimension_numbers<[1], [0], [0], [1], [0, 0, 1, 1], [], []>} : vector<2x32xf32>, vector<32x32xf32>, vector<2x32xf32> -> vector<2x32xf32>
    %32 = arith.addf %30, %31 : vector<2x32xf32>
    %33 = math.tanh %32 : vector<2x32xf32>
    %34 = vector.extract_strided_slice %7 {offsets = [12, 0], sizes = [2, 32], strides = [1, 1]} : vector<16x32xf32> to vector<2x32xf32>
    %cst_12 = arith.constant dense<0.000000e+00> : vector<2x32xf32>
    %35 = tpu.matmul %33, %8, %cst_12 {dimension_numbers = #tpu.dot_dimension_numbers<[1], [0], [0], [1], [0, 0, 1, 1], [], []>} : vector<2x32xf32>, vector<32x32xf32>, vector<2x32xf32> -> vector<2x32xf32>
    %36 = arith.addf %34, %35 : vector<2x32xf32>
    %37 = math.tanh %36 : vector<2x32xf32>
    %38 = vector.extract_strided_slice %7 {offsets = [14, 0], sizes = [2, 32], strides = [1, 1]} : vector<16x32xf32> to vector<2x32xf32>
    %cst_13 = arith.constant dense<0.000000e+00> : vector<2x32xf32>
    %39 = tpu.matmul %37, %8, %cst_13 {dimension_numbers = #tpu.dot_dimension_numbers<[1], [0], [0], [1], [0, 0, 1, 1], [], []>} : vector<2x32xf32>, vector<32x32xf32>, vector<2x32xf32> -> vector<2x32xf32>
    %40 = arith.addf %38, %39 : vector<2x32xf32>
    %41 = math.tanh %40 : vector<2x32xf32>
    %c0_14 = arith.constant 0 : index
    %c0_15 = arith.constant 0 : index
    %42 = vector.load %arg3[%c0_14, %c0_15] : memref<32x8xf32, #tpu.memory_space<vmem>>, vector<32x8xf32>
    %cst_16 = arith.constant dense<0.000000e+00> : vector<2x8xf32>
    %43 = tpu.matmul %41, %42, %cst_16 {dimension_numbers = #tpu.dot_dimension_numbers<[1], [0], [0], [1], [0, 0, 1, 1], [], []>} : vector<2x32xf32>, vector<32x8xf32>, vector<2x8xf32> -> vector<2x8xf32>
    %c0_17 = arith.constant 0 : index
    %c0_18 = arith.constant 0 : index
    %44 = vector.load %arg4[%c0_17, %c0_18] : memref<1x8xf32, #tpu.memory_space<vmem>>, vector<1x8xf32>
    %45 = vector.broadcast %44 : vector<1x8xf32> to vector<2x8xf32>
    %46 = arith.addf %43, %45 : vector<2x8xf32>
    %c0_19 = arith.constant 0 : index
    %c0_20 = arith.constant 0 : index
    %47 = vector.load %arg5[%c0_19, %c0_20] : memref<2x8xf32, #tpu.memory_space<vmem>>, vector<2x8xf32>
    tpu.vector_store %arg5[%c0_19, %c0_20], %46 {strides = array<i32>} : memref<2x8xf32, #tpu.memory_space<vmem>>, vector<2x8xf32>,
    return
  }
}

</mosaic_0001>

<bundles_post_ra>
// kernel: torch_model_forward.1
= control target key start
LH: loop header
LB: loop body
LE: loop exit
PB: predicated region body
PF: predicated region fallthrough
CT: control target
= control target key end

     0   :  { %vm48_vm0 = vcmask 1042432   ;;  %v413_v2 = vmov 0   ;;  %s502_s0 = inlined_call_operand.vmem [shape: s32[16,1], index: 0, kind: input, shape index: {}]   ;;  %s503_s1 = inlined_call_operand.vmem [shape: f32[27,32], index: 1, kind: input, shape index: {}]   ;;  %s504_s2 = inlined_call_operand.vmem [shape: f32[32,32], index: 2, kind: input, shape index: {}]   ;;  %s505_s3 = inlined_call_operand.vmem [shape: f32[32,8], index: 3, kind: input, shape index: {}]   ;;  %s506_s4 = inlined_call_operand.vmem [shape: f32[1,8], index: 4, kind: input, shape index: {}]   ;;  %s507_s5 = inlined_call_operand.hbm [shape: f32[2,8], index: 5, kind: output, shape index: {}]  }
   0x1   :  { %v23_v0 = vld [vmem:[%s502_s0] sm:$0xff]  ;;  %v40_v1 = vld [vmem:[%s503_s1 + $0x18] sm:$0x7]  ;;  %369 = vset.pattern.permute.xlu0 %v413_v2  ;;  %v39_v4 = vld [vmem:[%s503_s1 + $0x10] sm:$0xff] }
   0x2   :  { %355 = vmatpush.msk.msra.mxu0 %vm48_vm0, %v40_v1  ;;  %v78_v3 = vld [vmem:[%s504_s2 + $0x18] sm:$0xff]  ;;  %v77_v5 = vld [vmem:[%s504_s2 + $0x10] sm:$0xff]  ;;  %26 = vperm.xlu0 %369, %v23_v0   ;;  %v38_v6 = vld [vmem:[%s503_s1 + $0x8] sm:$0xff] }
   0x3   :  { %95 = vmatpush.msra.mxu1 %v78_v3  ;;  %v76_v7 = vld [vmem:[%s504_s2 + $0x8] sm:$0xff]  ;;  %120 = vmatpush.msra.mxu2 %v78_v3 }
   0x4   :  { %65 = vmatpush.msra.mxu0 %v39_v4 }
   0x5   :  { %10 = vsyncpa [#allocation3], 0  ;;  %96 = vmatpush.msra.mxu1 %v77_v5  ;;  %149 = vmatpush.msra.mxu3 %v78_v3  ;;  %v24_v8 = vld [vmem:[%s502_s0 + $0x8] sm:$0xff]  ;;  %v37_v9 = vld [vmem:[%s503_s1] sm:$0xff]  ;;  %v414_v11 = vmov 0.0   ;;  %v21_v12 = vlaneseq  ;;  %vm41_vm1 = vcmask 220160  }
   0x6   :  { %66 = vmatpush.msra.mxu0 %v38_v6  ;;  %121 = vmatpush.msra.mxu2 %v77_v5  ;;  %v75_v10 = vld [vmem:[%s504_s2] sm:$0xff]  ;;  %vm79_vm4 = vcmask 261120   ;;  %v306_v51 = vld [vmem:[%s505_s3 + $0x18] sm:$0xff]  ;;  %v305_v52 = vld [vmem:[%s505_s3 + $0x10] sm:$0xff]  ;;  %s415_s20 = smov [#allocation2]   ;;  %s344_s24 = sshll.u32 %s507_s5, 4  ;;  %s345_s24 = int_to_ptr.hbm [resolvable:$true] %s344_s24 }
   0x7   :  { %97 = vmatpush.msra.mxu1 %v76_v7  ;;  %150 = vmatpush.msra.mxu3 %v77_v5  ;;  %v22_v13 = vand.u32 127, %v21_v12  ;;  %v304_v53 = vld [vmem:[%s505_s3 + $0x8] sm:$0xff]  ;;  %v303_v54 = vld [vmem:[%s505_s3] sm:$0xff]  ;;  %s342_s21 = sshll.u32 %s415_s20, 4  ;;  %vm335_vm5 = vcmask 58368   ;;  %s343_s21 = int_to_ptr.vmem [resolvable:$true] %s342_s21 }
   0x8   :  { %122 = vmatpush.msra.mxu2 %v76_v7  ;;  %67 = vmatpush.msra.mxu0 %v37_v9  ;;  %v370_v60 = vld [vmem:[%s506_s4] ss:$0 sm:$0xff] }
   0x9   :  { %151 = vmatpush.msra.mxu3 %v76_v7  ;;  %98 = vmatpush.msra.mxu1 %v75_v10 }
   0xa   :  { %29 = vperm.xlu0 %369, %v24_v8   ;;  %99 = vmatmul.f32.vlgmr.msra.gmra.mxu1 %v414_v11 }
   0xb   :  { %123 = vmatpush.msra.mxu2 %v75_v10  ;;  %152 = vmatpush.msra.mxu3 %v75_v10 }
   0xc   :  { %178 = vmatpush.msrb.mxu1 %v78_v3  ;;  %261 = vmatpush.msrb.mxu0 %v78_v3 }
   0xd   :  { %207 = vmatpush.msrb.mxu2 %v78_v3  ;;  %232 = vmatpush.msrb.mxu3 %v78_v3 }
   0xe   :  { %179 = vmatpush.msrb.mxu1 %v77_v5  ;;  %262 = vmatpush.msrb.mxu0 %v77_v5 }
   0xf   :  { %208 = vmatpush.msrb.mxu2 %v77_v5  ;;  %233 = vmatpush.msrb.mxu3 %v77_v5 }
  0x10   :  { %180 = vmatpush.msrb.mxu1 %v76_v7  ;;  %263 = vmatpush.msrb.mxu0 %v76_v7 }
  0x11   :  { %209 = vmatpush.msrb.mxu2 %v76_v7  ;;  %234 = vmatpush.msrb.mxu3 %v76_v7 }
  0x12   :  { %181 = vmatpush.msrb.mxu1 %v75_v10  ;;  %264 = vmatpush.msrb.mxu0 %v75_v10 }
  0x13   :  { %210 = vmatpush.msrb.mxu2 %v75_v10  ;;  %235 = vmatpush.msrb.mxu3 %v75_v10 }
  0x14   :  { %290 = vmatpush.msra.mxu1 %v78_v3 }
  0x16   :  { %291 = vmatpush.msra.mxu1 %v77_v5 }
  0x18   :  { %292 = vmatpush.msra.mxu1 %v76_v7 }
  0x1a   :  { %293 = vmatpush.msra.mxu1 %v75_v10 }
  0x74   :  { %v27_v14 = vpop.permute.xlu0 %26 }
  0x75   :  { %vm31_vm2 = vcmp.eq.s32.totalorder %v27_v14, %v22_v13 }
  0x76   :  { %v353_v15 = vsel %vm31_vm2, 1.0, %v414_v11 }
  0x77   :  { %356 = vmatmul.msk.f32.vlgmr.msra.gmra.mxu0 %vm41_vm1, %v353_v15 }
  0x7c   :  { %v30_v16 = vpop.permute.xlu0 %29 }
  0x7d   :  { %vm32_vm3 = vcmp.eq.s32.totalorder %v30_v16, %v22_v13 }
  0x7e   :  { %v354_v17 = vsel %vm32_vm3, 1.0, %v414_v11 }
  0x7f   :  { %357 = vmatmul.msk.f32.gmra.mxu0 %vm41_vm1, %v354_v17 }
  0x87   :  { %v100_v18 = vpop.f32.mrf.mxu1 }
  0xf4   :  { %v69_v19 = vpop.f32.mrf.mxu0 }
  0xf5   :  { %v103_v20 = vadd.f32 %v100_v18, %v69_v19 }
  0xf7   :  { %371 = vtanh.f32 %v103_v20 }
  0xfc   :  { %v72_v37 = vpop.f32.mrf.mxu0 }
  0xfd   :  { %v372_v21 = vpop.eup %371 }
  0xfe   :  { %358 = vmatmul.msk.f32.vlgmr.msra.gmra.mxu2 %vm79_vm4, %v372_v21 }
  0xff   :  { %327 = vmatpush.msra.mxu2 %v306_v51 }
 0x101   :  { %328 = vmatpush.msra.mxu2 %v305_v52 }
 0x103   :  { %329 = vmatpush.msra.mxu2 %v304_v53 }
 0x105   :  { %330 = vmatpush.msra.mxu2 %v303_v54 }
 0x181   :  { %v125_v22 = vpop.f32.mrf.mxu2 }
 0x182   :  { %v129_v23 = vrot.slane %v125_v22, 6 }
 0x184   :  { %v131_v24 = vadd.f32 %v129_v23, %v69_v19 }
 0x186   :  { %373 = vtanh.f32 %v131_v24 }
 0x18c   :  { %v374_v25 = vpop.eup %373 }
 0x18d   :  { %v134_v26 = vrot.slane %v374_v25, 2 }
 0x18f   :  { %359 = vmatmul.msk.f32.vlgmr.msra.gmra.mxu3 %vm79_vm4, %v134_v26 }
 0x212   :  { %v154_v27 = vpop.f32.mrf.mxu3 }
 0x213   :  { %v158_v28 = vrot.slane %v154_v27, 4 }
 0x215   :  { %v160_v29 = vadd.f32 %v158_v28, %v69_v19 }
 0x217   :  { %375 = vtanh.f32 %v160_v29 }
 0x21d   :  { %v376_v30 = vpop.eup %375 }
 0x21e   :  { %v163_v31 = vrot.slane %v376_v30, 4 }
 0x220   :  { %360 = vmatmul.msk.f32.vlgmr.msrb.gmra.mxu1 %vm79_vm4, %v163_v31 }
 0x29d   :  { %v183_v32 = vpop.f32.mrf.mxu1 }
 0x29e   :  { %v187_v33 = vrot.slane %v183_v32, 2 }
 0x2a0   :  { %v189_v34 = vadd.f32 %v187_v33, %v69_v19 }
 0x2a2   :  { %377 = vtanh.f32 %v189_v34 }
 0x2a8   :  { %v378_v35 = vpop.eup %377 }
 0x2a9   :  { %v192_v36 = vrot.slane %v378_v35, 6 }
 0x2ab   :  { %361 = vmatmul.msk.f32.vlgmr.msrb.gmra.mxu2 %vm79_vm4, %v192_v36 }
 0x32e   :  { %v212_v38 = vpop.f32.mrf.mxu2 }
 0x32f   :  { %v215_v39 = vadd.f32 %v212_v38, %v72_v37 }
 0x331   :  { %379 = vtanh.f32 %v215_v39 }
 0x337   :  { %v380_v40 = vpop.eup %379 }
 0x338   :  { %362 = vmatmul.msk.f32.vlgmr.msrb.gmra.mxu3 %vm79_vm4, %v380_v40 }
 0x3bb   :  { %v237_v41 = vpop.f32.mrf.mxu3 }
 0x3bc   :  { %v241_v42 = vrot.slane %v237_v41, 6 }
 0x3be   :  { %v243_v43 = vadd.f32 %v241_v42, %v72_v37 }
 0x3c0   :  { %381 = vtanh.f32 %v243_v43 }
 0x3c6   :  { %v382_v44 = vpop.eup %381 }
 0x3c7   :  { %v246_v45 = vrot.slane %v382_v44, 2 }
 0x3c9   :  { %363 = vmatmul.msk.f32.vlgmr.msrb.gmra.mxu0 %vm79_vm4, %v246_v45 }
 0x446   :  { %v266_v46 = vpop.f32.mrf.mxu0 }
 0x447   :  { %v270_v47 = vrot.slane %v266_v46, 4 }
 0x449   :  { %v272_v48 = vadd.f32 %v270_v47, %v72_v37 }
 0x44b   :  { %383 = vtanh.f32 %v272_v48 }
 0x451   :  { %v384_v49 = vpop.eup %383 }
 0x452   :  { %v275_v50 = vrot.slane %v384_v49, 4 }
 0x454   :  { %364 = vmatmul.msk.f32.vlgmr.msra.gmra.mxu1 %vm79_vm4, %v275_v50 }
 0x4d1   :  { %v295_v55 = vpop.f32.mrf.mxu1 }
 0x4d2   :  { %v299_v56 = vrot.slane %v295_v55, 2 }
 0x4d4   :  { %v301_v57 = vadd.f32 %v299_v56, %v72_v37 }
 0x4d6   :  { %385 = vtanh.f32 %v301_v57 }
 0x4dc   :  { %v386_v58 = vpop.eup %385 }
 0x4dd   :  { %v312_v59 = vrot.slane %v386_v58, 6 }
 0x4df   :  { %365 = vmatmul.msk.f32.vlgmr.msra.gmra.mxu2 %vm79_vm4, %v312_v59 }
 0x562   :  { %v332_v61 = vpop.f32.mrf.mxu2 }
 0x563   :  { %v333_v62 = vadd.f32 %v370_v60, %v332_v61 }
 0x565   :  { %336 = vst.msk [vmem:[#allocation2] sm:$0x3] %vm335_vm5, %v333_v62 }
 0x566   :  { %347 = dma.vmem_to_hbm [thread:$0]  %s343_s21, 32, %s345_s24, [#allocation3]  }
 0x567   :  { %411 = dma.done.wait [#allocation3], 32  }
 0x568   :  { %412 = vsyncadd [#allocation3], 4294967264 }
 0x569   :  { %352 = vsyncpa [#allocation3], 1 }

</bundles_post_ra>
